<compile_context>
chip_gen: v5e
topology: v5e:2x2
jax: 0.10.0
libtpu: 0.0.40
codegen_flags: <defaults>
</compile_context>

<pallas_src>
import functools
import math

import jax
import jax.numpy as jnp
from jax.experimental import pallas as pl
from jax.experimental.pallas import tpu as pltpu


# ------------------------------------- the Pallas kernel -------------------------------------

def _channel_attn_kernel(x_ref, band_ref, o_ref, *, inv_hw):
    # x_ref / o_ref: (C, HW) view of one sample (batch dim squeezed by the BlockSpec).
    x2 = x_ref[...]                                                  # (C, HW), HW on lanes
    # Global average pool over the spatial (lane) axis -> (C, 1) column (XLU reduction).
    pooled = jnp.sum(x2, axis=1, keepdims=True) * inv_hw             # (C, 1)
    # ECA 1-D conv over the channel axis as a tiny precomputed band-matrix matvec.
    conv = jnp.dot(band_ref[...], pooled,
                   preferred_element_type=jnp.float32)               # (C, 1)
    attn = jax.nn.sigmoid(conv)                                      # EUP transcendental
    # Per-channel gate: broadcast over the lane axis; lane-dense store.
    o_ref[...] = (x2 * attn).astype(o_ref.dtype)


# ------------------------------------------ wrapper -------------------------------------------

def channel_attn_forward(x, conv_w):
    """x: (B, C, H, W) NCHW (same layout as the PyTorch module); conv_w: (k,) ECA conv taps."""
    b, c, h, w = x.shape
    hw = h * w
    k = conv_w.shape[0]
    pad = k // 2

    # Host-side glue: band matrix implementing the 'same'-padded cross-correlation over C.
    # PyTorch conv: out[co] = sum_i w[i] * in[co + i - pad]  =>  band[co, ci] = w[ci - co + pad].
    ci = jnp.arange(c)[:, None]
    cj = jnp.arange(c)[None, :]
    idx = cj - ci + pad
    band = jnp.where((idx >= 0) & (idx < k),
                     conv_w[jnp.clip(idx, 0, k - 1)], 0.0).astype(jnp.float32)   # (C, C)

    # Lane-dense layout: (B, C, H*W) with H*W on the lane axis (free reshape of NCHW).
    x2 = x.reshape(b, c, hw).astype(jnp.float32)

    out = pl.pallas_call(
        functools.partial(_channel_attn_kernel, inv_hw=1.0 / float(hw)),
        out_shape=jax.ShapeDtypeStruct((b, c, hw), jnp.float32),
        grid_spec=pltpu.PrefetchScalarGridSpec(
            num_scalar_prefetch=0,
            grid=(b,),
            in_specs=[
                pl.BlockSpec((None, c, hw), lambda i: (i, 0, 0)),   # one sample, batch squeezed
                pl.BlockSpec((c, c), lambda i: (0, 0)),             # band matrix (VMEM-resident)
            ],
            out_specs=pl.BlockSpec((None, c, hw), lambda i: (i, 0, 0)),
        ),
        # Batch samples are independent -> "parallel" (megacore sharding on v7x).
        compiler_params=pltpu.CompilerParams(dimension_semantics=("parallel",)),
    )(x2, band)
    return out.reshape(b, c, h, w)


# --------------------------------- pure-JAX reference (NCHW) ----------------------------------

def channel_attn_reference(x, conv_w):
    b, c, h, w = x.shape
    k = conv_w.shape[0]
    pad = k // 2
    pooled = x.mean(axis=(2, 3))                                     # (B, C)  adaptive avg pool
    pooled_p = jnp.pad(pooled, ((0, 0), (pad, pad)))
    attn = sum(conv_w[i] * pooled_p[:, i:i + c] for i in range(k))   # Conv2d(1,1,[1,k]) over C
    attn = jax.nn.sigmoid(attn)
    return x * attn[:, :, None, None]


# -------------------------------------------- main --------------------------------------------

if __name__ == "__main__":
    GAMMA, BCONST = 2, 1
    B, C, H, W = 2, 16, 16, 16                        # H*W = 256 -> lane-dense (multiple of 128)

    # kernel size exactly as in the PyTorch __init__
    k = int(abs(math.log2(C) / GAMMA + BCONST / GAMMA))
    k = k if k % 2 else k + 1                         # C=16 -> k=3

    key = jax.random.PRNGKey(0)
    kx, kw = jax.random.split(key)
    x = jax.random.normal(kx, (B, C, H, W), jnp.float32)
    conv_w = 0.5 * jax.random.normal(kw, (k,), jnp.float32)

    out = jax.block_until_ready(channel_attn_forward(x, conv_w))
    ref = jax.block_until_ready(channel_attn_reference(x, conv_w))

    assert out.shape == (B, C, H, W)
    assert bool(jnp.isfinite(out).all())
    max_diff = float(jnp.max(jnp.abs(out - ref)))
    assert max_diff < 1e-4, f"mismatch vs reference: {max_diff}"
    print("KERNEL_OK")
</pallas_src>

<mosaic_0001>
module attributes {stable_mosaic.version = 11 : i64} {
  func.func @_channel_attn_kernel(%arg0: i32, %arg1: memref<1x16x256xf32, #tpu.memory_space<vmem>>, %arg2: memref<16x16xf32, #tpu.memory_space<vmem>>, %arg3: memref<1x16x256xf32, #tpu.memory_space<vmem>>) attributes {dimension_semantics = [#tpu.dimension_semantics<parallel>], iteration_bounds = array<i64: 2>, scalar_prefetch = 0 : i64, scratch_operands = 0 : i64, tpu.core_type = #tpu.core_type<tc>, window_params = [{transform_indices = @transform_0, window_bounds = array<i64: 1, 16, 256>}, {pipeline_mode = #tpu.pipeline_mode<synchronous>, transform_indices = @transform_1, window_bounds = array<i64: 16, 16>}, {transform_indices = @transform_2, window_bounds = array<i64: 1, 16, 256>}]} {
    %c0 = arith.constant 0 : index
    %c0_0 = arith.constant 0 : index
    %c0_1 = arith.constant 0 : index
    %0 = vector.load %arg1[%c0, %c0_0, %c0_1] : memref<1x16x256xf32, #tpu.memory_space<vmem>>, vector<1x16x256xf32>
    %1 = vector.shape_cast %0 : vector<1x16x256xf32> to vector<16x256xf32>
    %cst = arith.constant dense<0.000000e+00> : vector<16xf32>
    %2 = vector.multi_reduction <add>, %1, %cst [1] : vector<16x256xf32> to vector<16xf32>
    %3 = vector.shape_cast %2 : vector<16xf32> to vector<16x1xf32>
    %cst_2 = arith.constant 3.906250e-03 : f32
    %4 = vector.broadcast %cst_2 : f32 to vector<16x1xf32>
    %5 = arith.mulf %3, %4 : vector<16x1xf32>
    %c0_3 = arith.constant 0 : index
    %c0_4 = arith.constant 0 : index
    %6 = vector.load %arg2[%c0_3, %c0_4] : memref<16x16xf32, #tpu.memory_space<vmem>>, vector<16x16xf32>
    %cst_5 = arith.constant dense<0.000000e+00> : vector<16x1xf32>
    %7 = tpu.matmul %6, %5, %cst_5 {dimension_numbers = #tpu.dot_dimension_numbers<[1], [0], [0], [1], [0, 0, 1, 1], [], []>} : vector<16x16xf32>, vector<16x1xf32>, vector<16x1xf32> -> vector<16x1xf32>
    %8 = arith.negf %7 : vector<16x1xf32>
    %9 = math.exp %8 : vector<16x1xf32>
    %cst_6 = arith.constant 1.000000e+00 : f32
    %10 = vector.broadcast %cst_6 : f32 to vector<16x1xf32>
    %11 = arith.addf %10, %9 : vector<16x1xf32>
    %12 = arith.divf %10, %11 : vector<16x1xf32>
    %13 = vector.broadcast %12 : vector<16x1xf32> to vector<16x256xf32>
    %14 = arith.mulf %1, %13 : vector<16x256xf32>
    %c0_7 = arith.constant 0 : index
    %c0_8 = arith.constant 0 : index
    %c0_9 = arith.constant 0 : index
    %15 = vector.load %arg3[%c0_7, %c0_8, %c0_9] : memref<1x16x256xf32, #tpu.memory_space<vmem>>, vector<1x16x256xf32>
    %16 = vector.shape_cast %15 : vector<1x16x256xf32> to vector<16x256xf32>
    %17 = vector.shape_cast %14 : vector<16x256xf32> to vector<1x16x256xf32>
    tpu.vector_store %arg3[%c0_7, %c0_8, %c0_9], %17 {strides = array<i32>} : memref<1x16x256xf32, #tpu.memory_space<vmem>>, vector<1x16x256xf32>,
    return
  }
  func.func @transform_0(%arg0: i32) -> (i32, i32, i32) {
    %c0_i32 = arith.constant 0 : i32
    %c0_i32_0 = arith.constant 0 : i32
    %c0_i32_1 = arith.constant 0 : i32
    return %arg0, %c0_i32, %c0_i32_0 : i32, i32, i32
  }
  func.func @transform_1(%arg0: i32) -> (i32, i32) {
    %c0_i32 = arith.constant 0 : i32
    %c0_i32_0 = arith.constant 0 : i32
    %c0_i32_1 = arith.constant 0 : i32
    return %c0_i32, %c0_i32_0 : i32, i32
  }
  func.func @transform_2(%arg0: i32) -> (i32, i32, i32) {
    %c0_i32 = arith.constant 0 : i32
    %c0_i32_0 = arith.constant 0 : i32
    %c0_i32_1 = arith.constant 0 : i32
    return %arg0, %c0_i32, %c0_i32_0 : i32, i32, i32
  }
}

</mosaic_0001>

<bundles_post_ra>
// kernel: tpu_custom_call.1
= control target key start
LH: loop header
LB: loop body
LE: loop exit
PB: predicated region body
PF: predicated region fallthrough
CT: control target
= control target key end

     0   :  { %7 = vsyncpa [#allocation3], 0  ;;  %s793_s0 = inlined_call_operand.hbm [shape: f32[2,16,256], index: 0, kind: input, shape index: {}]   ;;  %s794_s1 = inlined_call_operand.hbm [shape: f32[16,16], index: 1, kind: input, shape index: {}]   ;;  %s795_s2 = inlined_call_operand.hbm [shape: f32[2,16,256], index: 2, kind: output, shape index: {}]  }
   0x1   :  { %9 = vsyncpa [#allocation3 + $0x1], 0 }
   0x2   :  { %10 = vsyncpa [#allocation6], 0 }
   0x3   :  { %11 = vsyncpa [#allocation4], 0 }
   0x4   :  { %13 = vsyncpa [#allocation4 + $0x1], 0  ;;  %s633_s9 = smov 0   ;;  %s635_s10 = smov 0  }
   0x5   :  { %s637_s11 = smov 0   ;;  %s639_s12 = smov 0  }
   0x6 LB: > { %s654_s13 = sadd.s32 4294967295, %s608_s12   ;;  %s380_s14 = sadd.s32 4294967294, %s608_s12   ;;  %s608_s12 = sphi %s639_s12, %s805_s12   ;;  %s604_s11 = sphi %s637_s11, %s804_s11   ;;  %s600_s10 = sphi %s635_s10, %s803_s10   ;;  %s596_s9 = sphi %s633_s9, %s802_s9  }
   0x7   : > { %p39_p0 = scmp.ne.s32.totalorder %s600_s10, %s596_s9  ;;  %p40_p1 = scmp.eq.s32.totalorder %s654_s13, 0 }
   0x8   : > { %p84_p2 = scmp.eq.s32.totalorder %s654_s13, 1  ;;  %p90_p3 = scmp.eq.s32.totalorder %s380_s14, 1 }
   0x9   : > { %p663_p4 = por %p40_p1, %p39_p0  ;;  %p381_p5 = scmp.ge.s32.totalorder %s608_s12, 1 }
   0xa   : > { %p668_p6 = por %p90_p3, %p39_p0  ;;  %p97_p7 = scmp.lt.s32.totalorder %s608_s12, 3 }
   0xb   : > { %s108_s19 = sshll.u32 %s794_s1, 4  ;;  %s610_s21 = smov [#allocation5]   ;;  %s109_s19 = int_to_ptr.hbm [resolvable:$true] %s108_s19 }
   0xc   : > { %p676_p8 = pnand %p381_p5, %p97_p7  ;;  %s110_s22 = sshll.u32 %s610_s21, 4  ;;  %s111_s22 = int_to_ptr.vmem [resolvable:$true] %s110_s22 }
   0xd   : > { %s686_s23 = sadd.s32 1, %s608_s12   ;;  %s611_s24 = smov 128  }
   0xe   : > { %p412_p9 = pneg %p676_p8  ;;  %s612_s25 = smov 8  }
   0xf   : > { %s23_s26 = ssub.s32 %s608_s12, %s686_s23  ;;  %s26_s27 = sadd.s32 1, %s604_s11 }
  0x10   : > { %p413_p10 = pnand %p412_p9, %p40_p1  ;;  %p24_p12 = scmp.eq.s32.totalorder %s23_s26, 0 }
  0x11   : > { %p33_p13 = scmp.ne.s32.totalorder %s604_s11, %s600_s10  ;;  %p34_p0 = scmp.eq.s32.totalorder %s608_s12, 0 }
  0x12   : > { %415 = dma.hbm_to_vmem [thread:$0]  (!%p413_p10), %s109_s19, 256, %s111_s22, [#allocation6], %s611_s24, %s611_s24, %s612_s25  }
  0x13   : > { %p425_p3 = scmp.lt.s32.totalorder %s608_s12, 2  ;;  %p35_p5 = por %p34_p0, %p33_p13 }
  0x14   : > { %s696_s28 = scalar_select %p24_p12, %s604_s11, %s26_s27  }
  0x15   : > { %p700_p7 = por %p84_p2, %p33_p13  ;;  %s124_s30 = sand.u32 1, %s604_s11  }
  0x16   : > { %s400_s3 = sshll.u32 %s608_s12, 5  ;;  %s384_s4 = sshll.u32 %s124_s30, 5 }
  0x17   : > { %s133_s7 = scalar_lea.hbm %s793_s0, %s400_s3  ;;  %s128_s14 = scalar_lea.vmem [#allocation2], %s384_s4 }
  0x18   : > { %s134_s8 = sshll.u32 %s133_s7, 4  ;;  %s136_s17 = sshll.u32 %s128_s14, 4  ;;  %s135_s8 = int_to_ptr.hbm [resolvable:$true] %s134_s8  ;;  %s137_s17 = int_to_ptr.vmem [resolvable:$true] %s136_s17 }
  0x19   : > { %p711_p9 = pnand %p425_p3, %p35_p5  ;;  %s125_s19 = scalar_lea.sflag [#allocation3], %s124_s30 }
  0x1a   : > { %s508_s21 = sshra.s32 %s135_s8, 4  ;;  %s515_s26 = scalar_lea.hbm %s793_s0, 64  ;;  %s509_s21 = int_to_ptr.hbm [resolvable:$true] %s508_s21 }
  0x1b   : > { %s510_s22 = scalar_lea.hbm %s509_s21, 32  ;;  %p512_p10 = pneg %p711_p9 }
  0x1c   : > { %p511_p2 = scmp.ne.s32.totalorder %s509_s21, %s510_s22  ;;  %p516_p0 = scmp.lt.s32.totalorder %s509_s21, %s793_s0 }
  0x1d   : > { %p517_p3 = scmp.lt.s32.totalorder %s515_s26, %s510_s22 }
  0x1e   : > { %p513_p12 = pnand %p512_p10, %p511_p2 }
  0x1f   : > { %p518_p5 = por %p517_p3, %p516_p0 }
  0x20   : > { %p514_p13 = pneg %p513_p12 }
  0x22   : > { %p519_p11 = pnand %p518_p5, %p514_p13 }
  0x24   : > { %522 = shalt.err (!%p519_p11)
}
  0x25   : > { %s613_s30 = smov 256   ;;  %s614_s4 = smov 16  }
  0x26   : > { %419 = dma.hbm_to_vmem [thread:$0]  (!%p711_p9), %s135_s8, 512, %s137_s17, %s125_s19, %s613_s30, %s613_s30, %s614_s4  }
  0x27   : > { %148 = sbr.rel (%p676_p8) target bundleno = 461 (0x1cd), region = 28  ;;  %s728_s5 = sand.u32 (!%p676_p8), 1, %s600_s10  }
  0x28   : > { %s388_s6 = sshll.u32 (!%p676_p8), %s728_s5, 5  ;;  %s151_s7 = scalar_lea.sflag (!%p676_p8), [#allocation3], %s728_s5 }
  0x29   : > { %s154_s14 = scalar_lea.vmem (!%p676_p8), [#allocation2], %s388_s6 }
  0x2c   : > { %583 = dma.done.wait (%p663_p4), %s151_s7, 512  }
  0x2d   : > { %585 = vsyncadd (%p663_p4), %s151_s7, 4294966784 }
  0x2e   : > { %587 = dma.done.wait (%p40_p1), [#allocation6], 256  }
  0x2f   : > { %589 = vsyncadd (%p40_p1), [#allocation6], 4294967040  ;;  %v742_v0 = vld [vmem:[%s154_s14 + $0x10] sm:$0xff]  ;;  %v744_v1 = vld [vmem:[%s154_s14 + $0x18] sm:$0xff]  ;;  %vm195_vm0 = vcmask 130048   ;;  %v615_v12 = vmov 0  }
  0x30   : > { %v188_v2 = vadd.f32 %v744_v1, %v742_v0  ;;  %v748_v3 = vld [vmem:[%s154_s14] sm:$0xff]  ;;  %v750_v4 = vld [vmem:[%s154_s14 + $0x8] sm:$0xff]  ;;  %468 = vset.pattern.permute.xlu1 %v615_v12  ;;  %469 = vset.pattern.permute.xlu0 %v615_v12  ;;  %s401_s15 = sshll.u32 %s654_s13, 5  ;;  %s180_s20 = scalar_lea.vmem [#allocation7], %s388_s6 }
  0x31   : > { %v185_v5 = vadd.f32 %v750_v4, %v748_v3  ;;  %v193_v10 = vld [vmem:[#allocation5] sm:$0xff]  ;;  %v194_v11 = vld [vmem:[#allocation5 + $0x8] sm:$0xff]  ;;  %s293_s18 = scalar_lea.hbm %s795_s2, %s401_s15  ;;  %s294_s19 = sshll.u32 %s180_s20, 4  ;;  %s295_s19 = int_to_ptr.vmem [resolvable:$true] %s294_s19 }
  0x32   : > { %189 = vadd.xlane.f32.xlu0 %v188_v2  ;;  %s296_s21 = sshll.u32 %s293_s18, 4  ;;  %s282_s13 = scalar_lea.sflag [#allocation4], %s728_s5  ;;  %s297_s21 = int_to_ptr.hbm [resolvable:$true] %s296_s21 }
  0x33   : > { %s552_s22 = sshra.s32 %s297_s21, 4  ;;  %s558_s27 = scalar_lea.hbm %s795_s2, 64  ;;  %s553_s22 = int_to_ptr.hbm [resolvable:$true] %s552_s22 }
  0x34   : > { %s554_s24 = scalar_lea.hbm %s553_s22, 32  ;;  %p559_p11 = scmp.lt.s32.totalorder %s553_s22, %s795_s2 }
  0x35   : > { %p555_p1 = scmp.ne.s32.totalorder %s553_s22, %s554_s24  ;;  %p560_p9 = scmp.lt.s32.totalorder %s558_s27, %s554_s24 }
  0x37   : > { %p556_p4 = pnand %p555_p1, %p700_p7  ;;  %p561_p2 = por %p560_p9, %p559_p11 }
  0x39   : > { %p557_p8 = pneg %p556_p4 }
  0x3a   : > { %186 = vadd.xlane.f32.xlu0 %v185_v5 }
  0x3b   : > { %p562_p10 = pnand %p561_p2, %p557_p8 }
  0xa5   : > { %v190_v6 = vpop.xlane.xlu0 %189 }
  0xa6   : > { %v192_v7 = vmul.f32 0.00390625, %v190_v6 }
  0xa8   : > { %216 = vmatpush.msra.mxu0 %v192_v7  ;;  %402 = vmatpush.msra.mxu1 %v192_v7 }
  0xad   : > { %v187_v8 = vpop.xlane.xlu0 %186 }
  0xae   : > { %v191_v9 = vmul.f32 0.00390625, %v187_v8 }
  0xb0   : > { %217 = vmatpush.msra.mxu0 %v191_v9  ;;  %403 = vmatpush.msra.mxu1 %v191_v9 }
  0xb1   : > { %391 = vmatmul.msk.f32.vlgmr.msra.gmra.mxu0 %vm195_vm0, %v193_v10  ;;  %392 = vmatmul.msk.f32.vlgmr.msra.gmra.mxu1 %vm195_vm0, %v194_v11 }
 0x12e   : > { %v219_v13 = vpop.f32.mrf.mxu0  ;;  %v222_v14 = vpop.f32.mrf.mxu1 }
 0x12f   : > { %v393_v15 = vmul.f32 -1.442695, %v219_v13  ;;  %v394_v16 = vmul.f32 -1.442695, %v222_v14 }
 0x131   : > { %470 = vpow2.f32 %v393_v15 }
 0x132   : > { %472 = vpow2.f32 %v394_v16 }
 0x137   : > { %v471_v17 = vpop.eup %470 }
 0x138   : > { %v473_v18 = vpop.eup %472  ;;  %v231_v19 = vadd.f32 1.0, %v471_v17 }
 0x139   : > { %v232_v20 = vadd.f32 1.0, %v473_v18 }
 0x13a   : > { %474 = vrcp.f32 %v231_v19  ;;  %v244_v26 = vand.u32 2147483648, %v231_v19  ;;  %v242_v29 = vand.u32 2147483647, %v231_v19  ;;  %vm238_vm2 = vweird.f32 %v231_v19 }
 0x13b   : > { %476 = vrcp.f32 %v232_v20  ;;  %vm253_vm5 = vweird.f32 %v232_v20  ;;  %v259_v36 = vand.u32 2147483648, %v232_v20  ;;  %v257_v37 = vand.u32 2147483647, %v232_v20 }
 0x13c   : > { %v245_v32 = vor.u32 1.1754944e-38, %v244_v26  ;;  %vm243_vm4 = vcmp.eq.f32.partialorder %v242_v29, 8.507059e+37 }
 0x13d   : > { %v260_v39 = vor.u32 1.1754944e-38, %v259_v36  ;;  %vm258_vm8 = vcmp.eq.f32.partialorder %v257_v37, 8.507059e+37 }
 0x140   : > { %v475_v21 = vpop.eup %474 }
 0x141   : > { %v477_v22 = vpop.eup %476  ;;  %v234_v23 = vmul.f32 %v475_v21, %v231_v19  ;;  %vm239_vm1 = vweird.f32 %v475_v21 }
 0x142   : > { %v249_v24 = vmul.f32 %v477_v22, %v232_v20  ;;  %vm240_vm3 = vmor %vm238_vm2, %vm239_vm1  ;;  %vm254_vm6 = vweird.f32 %v477_v22 }
 0x143   : > { %v235_v25 = vsub.f32 1.0, %v234_v23  ;;  %vm255_vm7 = vmor %vm253_vm5, %vm254_vm6 }
 0x144   : > { %v250_v27 = vsub.f32 1.0, %v249_v24 }
 0x145   : > { %v236_v28 = vmul.f32 %v475_v21, %v235_v25 }
 0x146   : > { %v251_v31 = vmul.f32 %v477_v22, %v250_v27 }
 0x147   : > { %v237_v30 = vadd.f32 %v475_v21, %v236_v28 }
 0x148   : > { %v252_v35 = vadd.f32 %v477_v22, %v251_v31 }
 0x149   : > { %v241_v33 = vsel %vm240_vm3, %v475_v21, %v237_v30 }
 0x14a   : > { %v246_v34 = vsel %vm243_vm4, %v245_v32, %v241_v33  ;;  %v256_v38 = vsel %vm255_vm7, %v477_v22, %v252_v35 }
 0x14b   : > { %265 = vperm.xlu1 %468, %v246_v34   ;;  %v261_v40 = vsel %vm258_vm8, %v260_v39, %v256_v38 }
 0x153   : > { %270 = vperm.xlu1 %468, %v261_v40  }
 0x1bd   : > { %v266_v41 = vpop.permute.xlu1 %265 }
 0x1be   : > { %v273_v42 = vmul.f32 %v266_v41, %v748_v3  ;;  %v274_v43 = vmul.f32 %v266_v41, %v750_v4 }
 0x1c0   : > { %277 = vst [vmem:[%s180_s20] sm:$0xff] %v273_v42 }
 0x1c1   : > { %278 = vst [vmem:[%s180_s20 + $0x8] sm:$0xff] %v274_v43 }
 0x1c5   : > { %v271_v44 = vpop.permute.xlu1 %270 }
 0x1c6   : > { %v275_v45 = vmul.f32 %v271_v44, %v742_v0  ;;  %v276_v46 = vmul.f32 %v271_v44, %v744_v1 }
 0x1c8   : > { %279 = vst [vmem:[%s180_s20 + $0x10] sm:$0xff] %v275_v45 }
 0x1c9   : > { %280 = vst [vmem:[%s180_s20 + $0x18] sm:$0xff] %v276_v46 }
 0x1ca   : > { %565 = shalt.err (!%p562_p10)
}
 0x1cb   : > { %s616_s4 = smov 256   ;;  %s617_s5 = smov 16  }
 0x1cc   : > { %410 = dma.vmem_to_hbm [thread:$0]  (%p700_p7), %s295_s19, 512, %s297_s21, %s282_s13, %s616_s4, %s616_s4, %s617_s5  }
 0x1cd PF: > { %s311_s6 = sand.u32 1, %s596_s9   ;;  %p801_p12 = scmp.ge.s32.totalorder %s608_s12, 2 }
 0x1ce   : > { %s312_s7 = scalar_lea.sflag [#allocation4], %s311_s6 }
 0x1cf   : > { %p421_p13 = pnand %p801_p12, %p668_p6 }
 0x1d1   : > { %p422_p0 = pneg %p421_p13 }
 0x1d3   : > { %591 = dma.done.wait (%p422_p0), %s312_s7, 512  }
 0x1d4   : > { %593 = vsyncadd (%p422_p0), %s312_s7, 4294966784  ;;  %p16_p3 = scmp.ge.s32.totalorder %s686_s23, 4   ;;  %s802_s9 = smov %s600_s10 }
 0x1d5   : > { %s803_s10 = smov %s604_s11  ;;  %s804_s11 = smov %s696_s28 }
 0x1d6   : > { %s805_s12 = smov %s686_s23  ;;  %18 = sbr.rel (!%p16_p3) target bundleno = 6 (0x6), region = 77 }
 0x1db   :  { %318 = vsyncpa [#allocation3], 1 }
 0x1dc   :  { %320 = vsyncpa [#allocation3 + $0x1], 1 }
 0x1dd   :  { %321 = vsyncpa [#allocation6], 1 }
 0x1de   :  { %322 = vsyncpa [#allocation4], 1 }
 0x1df   :  { %324 = vsyncpa [#allocation4 + $0x1], 1 }

</bundles_post_ra>
